<compile_context>
chip_gen: v7x
topology: tpu7x:2x2x1
jax: 0.10.0
libtpu: 0.0.40
codegen_flags: <defaults>
</compile_context>

<pallas_src>
import functools

import jax
import jax.numpy as jnp
from jax.experimental import pallas as pl
from jax.experimental.pallas import tpu as pltpu


_LANE = 128
_SUBLANE = 8


def _round_up(x: int, m: int) -> int:
    return ((x + m - 1) // m) * m


def _make_decoder_kernel(num_blocks: int, d_pad: int, n_size: int, n_interval: int):
    """Kernel closure for a fixed packed-parameter layout."""

    def kernel(x_ref, w_ref, out_ref):
        # x_ref   : (TB, d_pad) f32    [z | c | 0...0 | 1]   (ones lane = bias lane)
        # w_ref   : (num_blocks*d_pad, d_pad) bf16 packed weight blocks
        # out_ref : (TB, d_pad) f32    [softmax(size) | softmax(interval) | 0...]
        h = x_ref[...]

        # Hidden stack: Linear (bias folded into the ones-lane row) + ReLU.
        # Zero-padded weight rows/cols keep padding lanes at exactly 0, and
        # W[d_pad-1, d_pad-1] = 1 keeps the ones-lane alive through ReLU.
        for blk in range(num_blocks - 1):
            w = w_ref[pl.ds(blk * d_pad, d_pad), :]
            h = jnp.maximum(
                jnp.dot(h.astype(jnp.bfloat16), w,
                        preferred_element_type=jnp.float32),
                0.0,
            )

        # Fused output head: one matmul -> [size_logits | interval_logits | junk].
        w = w_ref[pl.ds((num_blocks - 1) * d_pad, d_pad), :]
        logits = jnp.dot(h.astype(jnp.bfloat16), w,
                         preferred_element_type=jnp.float32)

        # Fused dual softmax: one exp, one reciprocal, one lane-dense store.
        col = jax.lax.broadcasted_iota(jnp.int32, logits.shape, 1)
        size_mask = col < n_size
        valid = col < (n_size + n_interval)
        neg = jnp.float32(-1e30)

        x = jnp.where(valid, logits, neg)
        m_size = jnp.max(jnp.where(size_mask, x, neg), axis=1, keepdims=True)
        m_int = jnp.max(jnp.where(size_mask, neg, x), axis=1, keepdims=True)
        m = jnp.where(size_mask, m_size, m_int)          # per-lane group max
        e = jnp.exp(x - m)                               # invalid lanes -> exactly 0
        s_size = jnp.sum(jnp.where(size_mask, e, 0.0), axis=1, keepdims=True)
        s_int = jnp.sum(e, axis=1, keepdims=True) - s_size
        s = jnp.where(size_mask, s_size, s_int)          # per-lane denominator
        r = pl.reciprocal(s, approx=True)                # EUP vrcp
        r = r * (2.0 - s * r)                            # one Newton step
        out_ref[...] = e * r

    return kernel


def pack_decoder_params(params):
    """Packs all layers into one lane-dense bf16 slab (host side, once).

    Each block is a (d_pad, d_pad) tile holding the zero-padded weight, the
    bias in row d_pad-1 (applied via the activation's constant-1 lane) and a 1
    at (d_pad-1, d_pad-1) so the constant-1 lane survives ReLU.
    """
    # Block 0: fused input projection (vstack weights, fold biases).
    w_blocks = [jnp.concatenate([params["w_lh"], params["w_ch"]], axis=0)]
    b_blocks = [params["b_lh"] + params["b_ch"]]
    # Hidden MLP stack.
    for w, b in params["hidden"]:
        w_blocks.append(w)
        b_blocks.append(b)
    # Last block: fused output heads (hstack weights, concat biases).
    w_blocks.append(jnp.concatenate([params["w_size"], params["w_int"]], axis=1))
    b_blocks.append(jnp.concatenate([params["b_size"], params["b_int"]], axis=1))

    n_size = int(params["w_size"].shape[1])
    n_interval = int(params["w_int"].shape[1])
    max_dim = max(max(w.shape) for w in w_blocks)
    d_pad = _round_up(max_dim + 1, _LANE)          # +1 reserves the ones-lane
    assert n_size + n_interval <= d_pad - 1, "output heads must fit below ones-lane"

    def pad_block(w, b):
        in_dim, out_dim = w.shape
        blk = jnp.zeros((d_pad, d_pad), jnp.float32)
        blk = blk.at[:in_dim, :out_dim].set(w)
        blk = blk.at[d_pad - 1, :out_dim].set(b[0])      # bias row (ones-lane input)
        blk = blk.at[d_pad - 1, d_pad - 1].set(1.0)      # propagate the ones-lane
        return blk

    w_slab = jnp.concatenate(
        [pad_block(w, b) for w, b in zip(w_blocks, b_blocks)], axis=0
    ).astype(jnp.bfloat16)

    meta = dict(
        num_blocks=len(w_blocks),
        d_pad=int(d_pad),
        n_size=n_size,
        n_interval=n_interval,
    )
    return w_slab, meta


@functools.partial(
    jax.jit, static_argnames=("num_blocks", "d_pad", "n_size", "n_interval")
)
def _decoder_forward_impl(z, c, w_slab, *, num_blocks, d_pad, n_size, n_interval):
    batch = z.shape[0]
    nz, nc = z.shape[1], c.shape[1]

    # Batch tile: single block at small batch, 128-row parallel blocks at scale.
    tb = min(128, _round_up(batch, _SUBLANE))
    b_pad = _round_up(batch, tb)

    # Assemble [z | c | 0...0 | 1]; the trailing 1 is the bias lane.
    x = jnp.concatenate(
        [
            z.astype(jnp.float32),
            c.astype(jnp.float32),
            jnp.zeros((batch, d_pad - nz - nc - 1), jnp.float32),
            jnp.ones((batch, 1), jnp.float32),
        ],
        axis=1,
    )
    if b_pad > batch:
        x = jnp.pad(x, ((0, b_pad - batch), (0, 0)))

    cost = pl.CostEstimate(
        flops=2 * b_pad * num_blocks * d_pad * d_pad,
        transcendentals=b_pad * d_pad,
        bytes_accessed=x.size * 4 + w_slab.size * 2 + b_pad * d_pad * 4,
    )

    packed_out = pl.pallas_call(
        _make_decoder_kernel(num_blocks, d_pad, n_size, n_interval),
        out_shape=jax.ShapeDtypeStruct((b_pad, d_pad), jnp.float32),
        grid=(b_pad // tb,),
        in_specs=[
            pl.BlockSpec((tb, d_pad), lambda i: (i, 0)),
            pl.BlockSpec((num_blocks * d_pad, d_pad), lambda i: (0, 0)),
        ],
        out_specs=pl.BlockSpec((tb, d_pad), lambda i: (i, 0)),
        compiler_params=pltpu.CompilerParams(
            dimension_semantics=("parallel",)
        ),
        cost_estimate=cost,
    )(x, w_slab)

    size = packed_out[:batch, :n_size]
    interval = packed_out[:batch, n_size : n_size + n_interval]
    return size, interval


def decoder_forward(z, c, packed):
    """Runs the Decoder forward pass as one Pallas kernel. Returns [size, interval]."""
    w_slab, meta = packed
    size, interval = _decoder_forward_impl(z, c, w_slab, **meta)
    return [size, interval]


def _init_linear(key, fan_in, fan_out):
    """PyTorch-style uniform(-1/sqrt(fan_in), 1/sqrt(fan_in)) init.

    Weight returned already transposed to (fan_in, fan_out); bias as (1, fan_out)."""
    kw, kb = jax.random.split(key)
    bound = 1.0 / jnp.sqrt(jnp.asarray(fan_in, jnp.float32))
    w = jax.random.uniform(kw, (fan_in, fan_out), jnp.float32, -bound, bound)
    b = jax.random.uniform(kb, (1, fan_out), jnp.float32, -bound, bound)
    return w, b


def init_decoder_params(key, n_size, n_interval, n_condition, hidden_dims, n_latent):
    keys = jax.random.split(key, 4 + len(hidden_dims))
    w_lh, b_lh = _init_linear(keys[0], n_latent, hidden_dims[0])
    w_ch, b_ch = _init_linear(keys[1], n_condition, hidden_dims[0])
    hidden = []
    in_dim = hidden_dims[0]
    for i, h_dim in enumerate(hidden_dims):
        w, b = _init_linear(keys[2 + i], in_dim, h_dim)
        hidden.append((w, b))
        in_dim = h_dim
    w_size, b_size = _init_linear(keys[2 + len(hidden_dims)], in_dim, n_size)
    w_int, b_int = _init_linear(keys[3 + len(hidden_dims)], in_dim, n_interval)
    return {
        "w_lh": w_lh,
        "b_lh": b_lh,
        "w_ch": w_ch,
        "b_ch": b_ch,
        "hidden": hidden,
        "w_size": w_size,
        "b_size": b_size,
        "w_int": w_int,
        "b_int": b_int,
    }


def _reference_forward(z, c, params):
    """Plain-JAX f32 reference mirroring the PyTorch module."""
    h = z @ params["w_lh"] + params["b_lh"] + c @ params["w_ch"] + params["b_ch"]
    h = jnp.maximum(h, 0.0)
    for w, b in params["hidden"]:
        h = jnp.maximum(h @ w + b, 0.0)
    size = jax.nn.softmax(h @ params["w_size"] + params["b_size"], axis=1)
    interval = jax.nn.softmax(h @ params["w_int"] + params["b_int"], axis=1)
    return [size, interval]


if __name__ == "__main__":
    # Small shapes consistent with the module's forward.
    batch = 8
    n_latent = 32
    n_condition = 8
    hidden_dims = [64, 64]
    n_size = 16
    n_interval = 12

    key = jax.random.PRNGKey(0)
    k_param, k_z, k_c = jax.random.split(key, 3)

    params = init_decoder_params(
        k_param, n_size, n_interval, n_condition, hidden_dims, n_latent
    )
    z = jax.random.normal(k_z, (batch, n_latent), jnp.float32)
    c = jax.random.normal(k_c, (batch, n_condition), jnp.float32)

    packed = pack_decoder_params(params)  # one-time host-side packing
    size, interval = decoder_forward(z, c, packed)
    jax.block_until_ready((size, interval))

    # Sanity check against the plain-JAX f32 reference.  Tolerances account
    # for the bf16 weight slab / bf16 MXU operands (review-requested perf
    # change); the sum-to-1 check is tight thanks to the Newton-refined
    # reciprocal.
    ref_size, ref_interval = _reference_forward(z, c, params)
    assert size.shape == (batch, n_size)
    assert interval.shape == (batch, n_interval)
    assert jnp.allclose(size, ref_size, atol=2e-2, rtol=2e-2)
    assert jnp.allclose(interval, ref_interval, atol=2e-2, rtol=2e-2)
    assert jnp.allclose(jnp.sum(size, axis=1), 1.0, atol=1e-4)
    assert jnp.allclose(jnp.sum(interval, axis=1), 1.0, atol=1e-4)
    assert bool(jnp.all(jnp.isfinite(size))) and bool(jnp.all(jnp.isfinite(interval)))

    print("KERNEL_OK")
</pallas_src>

<mosaic_0001>
module attributes {stable_mosaic.version = 11 : i64} {
  func.func @kernel(%arg0: i32, %arg1: memref<8x128xf32, #tpu.memory_space<vmem>>, %arg2: memref<512x128xbf16, #tpu.memory_space<vmem>>, %arg3: memref<8x128xf32, #tpu.memory_space<vmem>>) attributes {dimension_semantics = [#tpu.dimension_semantics<parallel>], iteration_bounds = array<i64: 1>, scalar_prefetch = 0 : i64, scratch_operands = 0 : i64, tpu.core_type = #tpu.core_type<tc>, window_params = [{transform_indices = @transform_0, window_bounds = array<i64: 8, 128>}, {pipeline_mode = #tpu.pipeline_mode<synchronous>, transform_indices = @transform_1, window_bounds = array<i64: 512, 128>}, {transform_indices = @transform_2, window_bounds = array<i64: 8, 128>}]} {
    %c0 = arith.constant 0 : index
    %c0_0 = arith.constant 0 : index
    %0 = vector.load %arg1[%c0, %c0_0] : memref<8x128xf32, #tpu.memory_space<vmem>>, vector<8x128xf32>
    %c0_1 = arith.constant 0 : index
    %c0_2 = arith.constant 0 : index
    %1 = vector.load %arg2[%c0_1, %c0_2] : memref<512x128xbf16, #tpu.memory_space<vmem>>, vector<128x128xbf16>
    %2 = arith.truncf %0 : vector<8x128xf32> to vector<8x128xbf16>
    %cst = arith.constant dense<0.000000e+00> : vector<8x128xf32>
    %3 = tpu.matmul %2, %1, %cst {dimension_numbers = #tpu.dot_dimension_numbers<[1], [0], [0], [1], [0, 0, 1, 1], [], []>} : vector<8x128xbf16>, vector<128x128xbf16>, vector<8x128xf32> -> vector<8x128xf32>
    %cst_3 = arith.constant 0.000000e+00 : f32
    %4 = vector.broadcast %cst_3 : f32 to vector<8x128xf32>
    %5 = arith.maximumf %3, %4 : vector<8x128xf32>
    %c128 = arith.constant 128 : index
    %c0_4 = arith.constant 0 : index
    %6 = vector.load %arg2[%c128, %c0_4] : memref<512x128xbf16, #tpu.memory_space<vmem>>, vector<128x128xbf16>
    %7 = arith.truncf %5 : vector<8x128xf32> to vector<8x128xbf16>
    %cst_5 = arith.constant dense<0.000000e+00> : vector<8x128xf32>
    %8 = tpu.matmul %7, %6, %cst_5 {dimension_numbers = #tpu.dot_dimension_numbers<[1], [0], [0], [1], [0, 0, 1, 1], [], []>} : vector<8x128xbf16>, vector<128x128xbf16>, vector<8x128xf32> -> vector<8x128xf32>
    %cst_6 = arith.constant 0.000000e+00 : f32
    %9 = vector.broadcast %cst_6 : f32 to vector<8x128xf32>
    %10 = arith.maximumf %8, %9 : vector<8x128xf32>
    %c256 = arith.constant 256 : index
    %c0_7 = arith.constant 0 : index
    %11 = vector.load %arg2[%c256, %c0_7] : memref<512x128xbf16, #tpu.memory_space<vmem>>, vector<128x128xbf16>
    %12 = arith.truncf %10 : vector<8x128xf32> to vector<8x128xbf16>
    %cst_8 = arith.constant dense<0.000000e+00> : vector<8x128xf32>
    %13 = tpu.matmul %12, %11, %cst_8 {dimension_numbers = #tpu.dot_dimension_numbers<[1], [0], [0], [1], [0, 0, 1, 1], [], []>} : vector<8x128xbf16>, vector<128x128xbf16>, vector<8x128xf32> -> vector<8x128xf32>
    %cst_9 = arith.constant 0.000000e+00 : f32
    %14 = vector.broadcast %cst_9 : f32 to vector<8x128xf32>
    %15 = arith.maximumf %13, %14 : vector<8x128xf32>
    %c384 = arith.constant 384 : index
    %c0_10 = arith.constant 0 : index
    %16 = vector.load %arg2[%c384, %c0_10] : memref<512x128xbf16, #tpu.memory_space<vmem>>, vector<128x128xbf16>
    %17 = arith.truncf %15 : vector<8x128xf32> to vector<8x128xbf16>
    %cst_11 = arith.constant dense<0.000000e+00> : vector<8x128xf32>
    %18 = tpu.matmul %17, %16, %cst_11 {dimension_numbers = #tpu.dot_dimension_numbers<[1], [0], [0], [1], [0, 0, 1, 1], [], []>} : vector<8x128xbf16>, vector<128x128xbf16>, vector<8x128xf32> -> vector<8x128xf32>
    %19 = tpu.iota {dimensions = array<i32: 1>} : vector<8x128xi32>
    %c16_i32 = arith.constant 16 : i32
    %20 = vector.broadcast %c16_i32 : i32 to vector<8x128xi32>
    %21 = arith.cmpi slt, %19, %20 : vector<8x128xi32>
    %c28_i32 = arith.constant 28 : i32
    %22 = vector.broadcast %c28_i32 : i32 to vector<8x128xi32>
    %23 = arith.cmpi slt, %19, %22 : vector<8x128xi32>
    %cst_12 = arith.constant -1.000000e+30 : f32
    %24 = vector.broadcast %cst_12 : f32 to vector<8x128xf32>
    %25 = arith.select %23, %18, %24 : vector<8x128xi1>, vector<8x128xf32>
    %cst_13 = arith.constant -1.000000e+30 : f32
    %26 = vector.broadcast %cst_13 : f32 to vector<8x128xf32>
    %27 = arith.select %21, %25, %26 : vector<8x128xi1>, vector<8x128xf32>
    %cst_14 = arith.constant dense<0xFF800000> : vector<8xf32>
    %28 = vector.multi_reduction <maximumf>, %27, %cst_14 [1] : vector<8x128xf32> to vector<8xf32>
    %29 = vector.shape_cast %28 : vector<8xf32> to vector<8x1xf32>
    %cst_15 = arith.constant -1.000000e+30 : f32
    %30 = vector.broadcast %cst_15 : f32 to vector<8x128xf32>
    %31 = arith.select %21, %30, %25 : vector<8x128xi1>, vector<8x128xf32>
    %cst_16 = arith.constant dense<0xFF800000> : vector<8xf32>
    %32 = vector.multi_reduction <maximumf>, %31, %cst_16 [1] : vector<8x128xf32> to vector<8xf32>
    %33 = vector.shape_cast %32 : vector<8xf32> to vector<8x1xf32>
    %34 = vector.shape_cast %29 : vector<8x1xf32> to vector<8x1xf32>
    %35 = vector.broadcast %34 : vector<8x1xf32> to vector<8x128xf32>
    %36 = vector.shape_cast %33 : vector<8x1xf32> to vector<8x1xf32>
    %37 = vector.broadcast %36 : vector<8x1xf32> to vector<8x128xf32>
    %38 = arith.select %21, %35, %37 : vector<8x128xi1>, vector<8x128xf32>
    %39 = arith.subf %25, %38 : vector<8x128xf32>
    %40 = math.exp %39 : vector<8x128xf32>
    %cst_17 = arith.constant 0.000000e+00 : f32
    %41 = vector.broadcast %cst_17 : f32 to vector<8x128xf32>
    %42 = arith.select %21, %40, %41 : vector<8x128xi1>, vector<8x128xf32>
    %cst_18 = arith.constant dense<0.000000e+00> : vector<8xf32>
    %43 = vector.multi_reduction <add>, %42, %cst_18 [1] : vector<8x128xf32> to vector<8xf32>
    %44 = vector.shape_cast %43 : vector<8xf32> to vector<8x1xf32>
    %cst_19 = arith.constant dense<0.000000e+00> : vector<8xf32>
    %45 = vector.multi_reduction <add>, %40, %cst_19 [1] : vector<8x128xf32> to vector<8xf32>
    %46 = vector.shape_cast %45 : vector<8xf32> to vector<8x1xf32>
    %47 = arith.subf %46, %44 : vector<8x1xf32>
    %48 = vector.shape_cast %44 : vector<8x1xf32> to vector<8x1xf32>
    %49 = vector.broadcast %48 : vector<8x1xf32> to vector<8x128xf32>
    %50 = vector.shape_cast %47 : vector<8x1xf32> to vector<8x1xf32>
    %51 = vector.broadcast %50 : vector<8x1xf32> to vector<8x128xf32>
    %52 = arith.select %21, %49, %51 : vector<8x128xi1>, vector<8x128xf32>
    %53 = tpu.reciprocal %52 {approx = true} : vector<8x128xf32> -> vector<8x128xf32>
    %54 = arith.mulf %52, %53 : vector<8x128xf32>
    %cst_20 = arith.constant 2.000000e+00 : f32
    %55 = vector.broadcast %cst_20 : f32 to vector<8x128xf32>
    %56 = arith.subf %55, %54 : vector<8x128xf32>
    %57 = arith.mulf %53, %56 : vector<8x128xf32>
    %58 = arith.mulf %40, %57 : vector<8x128xf32>
    %c0_21 = arith.constant 0 : index
    %c0_22 = arith.constant 0 : index
    %59 = vector.load %arg3[%c0_21, %c0_22] : memref<8x128xf32, #tpu.memory_space<vmem>>, vector<8x128xf32>
    tpu.vector_store %arg3[%c0_21, %c0_22], %58 {strides = array<i32>} : memref<8x128xf32, #tpu.memory_space<vmem>>, vector<8x128xf32>,
    return
  }
  func.func @transform_0(%arg0: i32) -> (i32, i32) {
    %c0_i32 = arith.constant 0 : i32
    %c0_i32_0 = arith.constant 0 : i32
    return %arg0, %c0_i32 : i32, i32
  }
  func.func @transform_1(%arg0: i32) -> (i32, i32) {
    %c0_i32 = arith.constant 0 : i32
    %c0_i32_0 = arith.constant 0 : i32
    %c0_i32_1 = arith.constant 0 : i32
    return %c0_i32, %c0_i32_0 : i32, i32
  }
  func.func @transform_2(%arg0: i32) -> (i32, i32) {
    %c0_i32 = arith.constant 0 : i32
    %c0_i32_0 = arith.constant 0 : i32
    return %arg0, %c0_i32 : i32, i32
  }
}

</mosaic_0001>

<bundles_post_ra>
// kernel: _decoder_forward_impl.1
= control target key start
LH: loop header
LB: loop body
LE: loop exit
PB: predicated region body
PF: predicated region fallthrough
CT: control target
= control target key end

     0   :  { %7 = vsyncpa [#allocation3], 0  ;;  %s696_s9 = smov [#allocation2]   ;;  %s779_s0 = inlined_call_operand.vmem [shape: f32[8,128], index: 0, kind: input, shape index: {}]   ;;  %s780_s1 = inlined_call_operand.hbm [shape: bf16[512,128], index: 1, kind: input, shape index: {}]   ;;  %s781_s2 = inlined_call_operand.vmem [shape: f32[8,128], index: 2, kind: output, shape index: {}]  }
   0x1   :  { %s15_s10 = sshll.u32 %s696_s9, 4  ;;  %s672_s13 = scalar_lea.hbm %s780_s1, 4096  ;;  %s16_s10 = int_to_ptr.vmem [resolvable:$true] %s15_s10 }
   0x2   :  { %p673_p0 = scmp.ne.s32.totalorder %s780_s1, %s672_s13  ;;  %p676_p1 = scmp.lt.u32.totalorder %s672_s13, %s780_s1 }
   0x4   :  { %p678_p2 = pnand %p676_p1, %p673_p0 }
   0x6   :  { %681 = shalt.err (!%p678_p2)
}
   0x7   :  { %s682_s18 = scalar_lea.vmem %s16_s10, 4096  ;;  %p687_p4 = scmp.lt.s32.totalorder %s16_s10, %s16_s10 }
   0x8   :  { %p683_p3 = scmp.ne.s32.totalorder %s16_s10, %s682_s18  ;;  %p688_p5 = scmp.lt.s32.totalorder %s682_s18, %s682_s18 }
   0xa   :  { %p689_p6 = por %p688_p5, %p687_p4 }
   0xc   :  { %p690_p7 = pnand %p689_p6, %p683_p3 }
   0xe   :  { %693 = shalt.err (!%p690_p7)
}
   0xf   :  { %s697_s19 = smov 64   ;;  %s698_s20 = smov 4  }
  0x10   :  { %21 = dma.hbm_to_vmem [thread:$0]  %s780_s1, 4096, %s16_s10, [#allocation3], %s697_s19, %s697_s19, %s698_s20  }
  0x11   :  { %694 = dma.done.wait [#allocation3], 4096  }
  0x12   :  { %695 = vsyncadd [#allocation3], 4294963200  ;;  %v699_v0 = vmov 0.0   ;;  %vm700_vm0 = vmmov 0   ;;  %v636_v1 = vld [vmem:[#allocation2] sm:$0xff]   ;;  %v637_v2 = vld [vmem:[#allocation2 + $0x8] sm:$0xff]   ;;  %v450_v53 = vlaneseq }
  0x13   :  { %551 = vmatprep.subr.bf16.mxu0 %v699_v0  ;;  %567 = vmatprep.mubr.msk.bf16.mxu0 %vm700_vm0, %v699_v0  ;;  %v638_v3 = vld [vmem:[#allocation2 + $0x10] sm:$0xff]   ;;  %v644_v4 = vld [vmem:[#allocation2 + $0x40] sm:$0xff]   ;;  %v639_v5 = vld [vmem:[#allocation2 + $0x18] sm:$0xff]  }
  0x14   :  { %571 = vmatprep.subr.bf16.mxu1 %v699_v0  ;;  %587 = vmatprep.mubr.msk.bf16.mxu1 %vm700_vm0, %v699_v0  ;;  %v645_v6 = vld [vmem:[#allocation2 + $0x48] sm:$0xff]   ;;  %v640_v7 = vld [vmem:[#allocation2 + $0x20] sm:$0xff]   ;;  %v646_v8 = vld [vmem:[#allocation2 + $0x50] sm:$0xff]   ;;  %v451_v54 = vand.u32 127, %v450_v53 }
  0x15   :  { %552 = vmatpush3.bf16.msra.mxu0 %v636_v1  ;;  %572 = vmatpush3.bf16.msra.mxu1 %v644_v4  ;;  %v641_v9 = vld [vmem:[#allocation2 + $0x28] sm:$0xff]   ;;  %v647_v10 = vld [vmem:[#allocation2 + $0x58] sm:$0xff]   ;;  %v642_v11 = vld [vmem:[#allocation2 + $0x30] sm:$0xff]  }
  0x16   :  { %553 = vmatprep.subr.bf16.mxu0 %v699_v0  ;;  %573 = vmatprep.subr.bf16.mxu1 %v699_v0  ;;  %v648_v12 = vld [vmem:[#allocation2 + $0x60] sm:$0xff]   ;;  %v643_v13 = vld [vmem:[#allocation2 + $0x38] sm:$0xff]   ;;  %v649_v15 = vld [vmem:[#allocation2 + $0x68] sm:$0xff]   ;;  %vm453_vm1 = vcmp.lt.s32.totalorder %v451_v54, 28  ;;  %vm452_vm2 = vcmp.lt.s32.totalorder %v451_v54, 16 }
  0x17   :  { %v26_v14 = vld [vmem:[%s779_s0] sm:$0xff]  ;;  %v650_v17 = vld [vmem:[#allocation2 + $0x70] sm:$0xff]   ;;  %v651_v18 = vld [vmem:[#allocation2 + $0x78] sm:$0xff]  }
  0x18   :  { %v43_v16 = vpack.c.bf16 %v26_v14, %v26_v14  ;;  %v652_v19 = vld [vmem:[#allocation2 + $0x80] sm:$0xff]   ;;  %v653_v20 = vld [vmem:[#allocation2 + $0x88] sm:$0xff]   ;;  %v654_v21 = vld [vmem:[#allocation2 + $0x90] sm:$0xff]  }
  0x19   :  { %554 = vmatpush3.bf16.msra.mxu0 %v637_v2  ;;  %574 = vmatpush3.bf16.msra.mxu1 %v645_v6  ;;  %v655_v22 = vld [vmem:[#allocation2 + $0x98] sm:$0xff]   ;;  %v656_v23 = vld [vmem:[#allocation2 + $0xa0] sm:$0xff]   ;;  %v657_v24 = vld [vmem:[#allocation2 + $0xa8] sm:$0xff]  }
  0x1a   :  { %555 = vmatprep.subr.bf16.mxu0 %v699_v0  ;;  %575 = vmatprep.subr.bf16.mxu1 %v699_v0  ;;  %v658_v25 = vld [vmem:[#allocation2 + $0xb0] sm:$0xff]   ;;  %v659_v32 = vld [vmem:[#allocation2 + $0xb8] sm:$0xff]   ;;  %v660_v33 = vld [vmem:[#allocation2 + $0xc0] sm:$0xff]  }
  0x1b   :  { %v661_v34 = vld [vmem:[#allocation2 + $0xc8] sm:$0xff]   ;;  %v662_v35 = vld [vmem:[#allocation2 + $0xd0] sm:$0xff]   ;;  %v663_v36 = vld [vmem:[#allocation2 + $0xd8] sm:$0xff]  }
  0x1c   :  { %v664_v37 = vld [vmem:[#allocation2 + $0xe0] sm:$0xff]   ;;  %v665_v38 = vld [vmem:[#allocation2 + $0xe8] sm:$0xff]   ;;  %v666_v39 = vld [vmem:[#allocation2 + $0xf0] sm:$0xff]  }
  0x1d   :  { %556 = vmatpush3.bf16.msra.mxu0 %v638_v3  ;;  %576 = vmatpush3.bf16.msra.mxu1 %v646_v8  ;;  %v667_v46 = vld [vmem:[#allocation2 + $0xf8] sm:$0xff]  }
  0x1e   :  { %557 = vmatprep.subr.bf16.mxu0 %v699_v0  ;;  %577 = vmatprep.subr.bf16.mxu1 %v699_v0 }
  0x21   :  { %558 = vmatpush3.bf16.msra.mxu0 %v639_v5  ;;  %578 = vmatpush3.bf16.msra.mxu1 %v647_v10 }
  0x22   :  { %559 = vmatprep.subr.bf16.mxu0 %v699_v0  ;;  %579 = vmatprep.subr.bf16.mxu1 %v699_v0 }
  0x25   :  { %560 = vmatpush3.bf16.msra.mxu0 %v640_v7  ;;  %580 = vmatpush3.bf16.msra.mxu1 %v648_v12 }
  0x26   :  { %561 = vmatprep.subr.bf16.mxu0 %v699_v0  ;;  %581 = vmatprep.subr.bf16.mxu1 %v699_v0 }
  0x29   :  { %562 = vmatpush3.bf16.msra.mxu0 %v641_v9  ;;  %582 = vmatpush3.bf16.msra.mxu1 %v649_v15 }
  0x2a   :  { %563 = vmatprep.subr.bf16.mxu0 %v699_v0  ;;  %583 = vmatprep.subr.bf16.mxu1 %v699_v0 }
  0x2d   :  { %564 = vmatpush3.bf16.msra.mxu0 %v642_v11  ;;  %584 = vmatpush3.bf16.msra.mxu1 %v650_v17 }
  0x2e   :  { %565 = vmatprep.subr.bf16.mxu0 %v699_v0  ;;  %585 = vmatprep.subr.bf16.mxu1 %v699_v0 }
  0x31   :  { %566 = vmatpush3.bf16.msra.mxu0 %v643_v13  ;;  %586 = vmatpush3.bf16.msra.mxu1 %v651_v18 }
  0x32   :  { %591 = vmatprep.subr.bf16.mxu0 %v699_v0  ;;  %611 = vmatprep.subr.bf16.mxu1 %v699_v0 }
  0x34   :  { %568 = vmatmul.mubr.bf16.vlgmr.msra.gmra.mrb[0].mxu0 %v43_v16 }
  0x35   :  { %607 = vmatprep.mubr.msk.bf16.mxu0 %vm700_vm0, %v699_v0  ;;  %592 = vmatpush3.bf16.msra.mxu0 %v652_v19 }
  0x36   :  { %593 = vmatprep.subr.bf16.mxu0 %v699_v0 }
  0x39   :  { %594 = vmatpush3.bf16.msra.mxu0 %v653_v20 }
  0x3a   :  { %595 = vmatprep.subr.bf16.mxu0 %v699_v0 }
  0x3d   :  { %596 = vmatpush3.bf16.msra.mxu0 %v654_v21 }
  0x3e   :  { %597 = vmatprep.subr.bf16.mxu0 %v699_v0 }
  0x41   :  { %598 = vmatpush3.bf16.msra.mxu0 %v655_v22 }
  0x42   :  { %599 = vmatprep.subr.bf16.mxu0 %v699_v0 }
  0x45   :  { %600 = vmatpush3.bf16.msra.mxu0 %v656_v23 }
  0x46   :  { %601 = vmatprep.subr.bf16.mxu0 %v699_v0 }
  0x49   :  { %602 = vmatpush3.bf16.msra.mxu0 %v657_v24 }
  0x4a   :  { %603 = vmatprep.subr.bf16.mxu0 %v699_v0 }
  0x4d   :  { %604 = vmatpush3.bf16.msra.mxu0 %v658_v25 }
  0x4e   :  { %605 = vmatprep.subr.bf16.mxu0 %v699_v0 }
  0x51   :  { %606 = vmatpush3.bf16.msra.mxu0 %v659_v32 }
 0x107   :  { %v126_v26 = vpop.f32.mrb[0].mxu0 }
 0x108   :  { %v132_v27 = vmax.f32 %v126_v26, 0.0  ;;  %v569_v28 = vpop.f32.mrb[1].mxu0 }
 0x109   :  { %v129_v29 = vpop.f32.mrb[2].mxu0 }
 0x10a   :  { %v149_v30 = vpack.c.bf16 %v132_v27, %v132_v27  ;;  %v570_v31 = vpop.f32.mrb[3].mxu0 }
 0x10c   :  { %588 = vmatmul.mubr.bf16.vlgmr.msra.gmra.mrb[0].mxu1 %v149_v30 }
 0x10d   :  { %627 = vmatprep.mubr.msk.bf16.mxu1 %vm700_vm0, %v699_v0  ;;  %612 = vmatpush3.bf16.msra.mxu1 %v660_v33 }
 0x10e   :  { %613 = vmatprep.subr.bf16.mxu1 %v699_v0 }
 0x111   :  { %614 = vmatpush3.bf16.msra.mxu1 %v661_v34 }
 0x112   :  { %615 = vmatprep.subr.bf16.mxu1 %v699_v0 }
 0x115   :  { %616 = vmatpush3.bf16.msra.mxu1 %v662_v35 }
 0x116   :  { %617 = vmatprep.subr.bf16.mxu1 %v699_v0 }
 0x119   :  { %618 = vmatpush3.bf16.msra.mxu1 %v663_v36 }
 0x11a   :  { %619 = vmatprep.subr.bf16.mxu1 %v699_v0 }
 0x11d   :  { %620 = vmatpush3.bf16.msra.mxu1 %v664_v37 }
 0x11e   :  { %621 = vmatprep.subr.bf16.mxu1 %v699_v0 }
 0x121   :  { %622 = vmatpush3.bf16.msra.mxu1 %v665_v38 }
 0x122   :  { %623 = vmatprep.subr.bf16.mxu1 %v699_v0 }
 0x125   :  { %624 = vmatpush3.bf16.msra.mxu1 %v666_v39 }
 0x126   :  { %625 = vmatprep.subr.bf16.mxu1 %v699_v0 }
 0x129   :  { %626 = vmatpush3.bf16.msra.mxu1 %v667_v46 }
 0x1df   :  { %v232_v40 = vpop.f32.mrb[0].mxu1 }
 0x1e0   :  { %v238_v41 = vmax.f32 %v232_v40, 0.0  ;;  %v589_v42 = vpop.f32.mrb[1].mxu1 }
 0x1e1   :  { %v235_v43 = vpop.f32.mrb[2].mxu1 }
 0x1e2   :  { %v255_v44 = vpack.c.bf16 %v238_v41, %v238_v41  ;;  %v590_v45 = vpop.f32.mrb[3].mxu1 }
 0x1e4   :  { %608 = vmatmul.mubr.bf16.vlgmr.msra.gmra.mrb[4].mxu0 %v255_v44 }
 0x2b7   :  { %v338_v47 = vpop.f32.mrb[4].mxu0 }
 0x2b8   :  { %v344_v48 = vmax.f32 %v338_v47, 0.0  ;;  %v609_v49 = vpop.f32.mrb[5].mxu0 }
 0x2b9   :  { %v341_v50 = vpop.f32.mrb[6].mxu0 }
 0x2ba   :  { %v361_v51 = vpack.c.bf16 %v344_v48, %v344_v48  ;;  %v610_v52 = vpop.f32.mrb[7].mxu0 }
 0x2bc   :  { %628 = vmatmul.mubr.bf16.vlgmr.msra.gmra.mrb[4].mxu1 %v361_v51 }
 0x38f   :  { %v444_v55 = vpop.f32.mrb[4].mxu1 }
 0x390   :  { %v454_v56 = vsel %vm453_vm1, %v444_v55, -1e+30  ;;  %v629_v57 = vpop.f32.mrb[5].mxu1 }
 0x391   :  { %v447_v58 = vpop.f32.mrb[6].mxu1  ;;  %v455_v59 = vsel %vm452_vm2, %v454_v56, -1e+30  ;;  %v458_v61 = vsel %vm452_vm2, -1e+30, %v454_v56 }
 0x392   :  { %456 = vmax.xlane.f32.xlu0 %v455_v59  ;;  %v630_v60 = vpop.f32.mrb[7].mxu1 }
 0x396   :  { %459 = vmax.xlane.f32.xlu0 %v458_v61 }
 0x41f   :  { %v457_v62 = vpop.xlane.xlu0 %456 }
 0x423   :  { %v460_v63 = vpop.xlane.xlu0 %459 }
 0x424   :  { %v461_v0 = vsel %vm452_vm2, %v457_v62, %v460_v63 }
 0x425   :  { %v462_v1 = vsub.f32 %v454_v56, %v461_v0 }
 0x427   :  { %v463_v2 = vmul.f32 1.442695, %v462_v1 }
 0x429   :  { %668 = vpow2.f32 %v463_v2 }
 0x433   :  { %v669_v3 = vpop.eup %668 }
 0x434   :  { %v465_v4 = vsel %vm452_vm2, %v669_v3, 0.0 }
 0x435   :  { %466 = vadd.xlane.f32.xlu1 %v465_v4 }
 0x439   :  { %468 = vadd.xlane.f32.xlu1 %v669_v3 }
 0x4c2   :  { %v467_v5 = vpop.xlane.xlu1 %466 }
 0x4c6   :  { %v469_v6 = vpop.xlane.xlu1 %468 }
 0x4c7   :  { %v470_v7 = vsub.f32 %v469_v6, %v467_v5 }
 0x4c9   :  { %v471_v8 = vsel %vm452_vm2, %v467_v5, %v470_v7 }
 0x4ca   :  { %670 = vrcp.f32 %v471_v8 }
 0x4d4   :  { %v671_v9 = vpop.eup %670 }
 0x4d5   :  { %v473_v10 = vmul.f32 %v671_v9, %v471_v8 }
 0x4d7   :  { %v474_v11 = vsub.f32 2.0, %v473_v10 }
 0x4d9   :  { %v475_v12 = vmul.f32 %v671_v9, %v474_v11 }
 0x4db   :  { %v476_v13 = vmul.f32 %v669_v3, %v475_v12 }
 0x4dd   :  { %477 = vst [vmem:[%s781_s2] sm:$0xff] %v476_v13 }
 0x4de   :  { %482 = vsyncpa [#allocation3], 1 }

</bundles_post_ra>
